<compile_context>
chip_gen: v6e
topology: v6e:2x2x1
jax: 0.10.0
libtpu: 0.0.40
codegen_flags: <defaults>
</compile_context>

<pallas_src>
import math
import numpy as np
import jax
import jax.numpy as jnp
from jax.experimental import pallas as pl
from jax.experimental.pallas import tpu as pltpu

HIDDEN_DIM = 32
INPUT_DIM = 2
NUM_LAYERS = 2
OUTPUT_DIM = 1
INPUT_DIM_PAD = 8     # pad contraction dim of the hoisted input projection
BATCH_PAD = 8         # pad batch to 8 sublanes
COMB_W = 8 * HIDDEN_DIM  # 256: interleaved gate width for both layers

# packed-slab row offsets
ROW_WIN = 0      # (8, 256)   extended input-projection weight
ROW_WBIG = 8     # (64, 256)  fused recurrent weight
ROW_BIAS = 72    # (1, 256)   combined b0/b1 bias (interleaved slots)
ROW_FCW = 80     # (32, 256)  fc weight in cols 0:OUTPUT_DIM
ROW_FCB = 112    # (1, 256)   fc bias in cols 0:OUTPUT_DIM
SLAB_ROWS = 120


def lstm_kernel(x_ref, slab_ref, out_ref, pre_ref):
    # x_ref   : ((T+1)*Bp, Dpad)  time-major rows (t, b); last timestep is a zero dummy
    # slab_ref: (120, 256)        packed params
    # pre_ref : ((T+1)*Bp, 256)   VMEM scratch for the hoisted input projection
    H = HIDDEN_DIM
    Bp = BATCH_PAD
    TB = x_ref.shape[0]
    T1 = TB // Bp          # T + 1 pipelined iterations
    T = T1 - 1
    B = out_ref.shape[0]

    # ---- hoist all weight / bias loads out of the recurrence ----
    w_in = slab_ref[ROW_WIN:ROW_WIN + INPUT_DIM_PAD, :]            # (8, 256)
    w_big = slab_ref[ROW_WBIG:ROW_WBIG + 2 * H, :]                 # (64, 256)
    bias = slab_ref[ROW_BIAS:ROW_BIAS + 1, :]                      # (1, 256)
    fcw = slab_ref[ROW_FCW:ROW_FCW + H, 0:OUTPUT_DIM]              # (32, OUT)
    fcb = slab_ref[ROW_FCB:ROW_FCB + 1, 0:OUTPUT_DIM]              # (1, OUT)

    # ---- hoisted input projection for all timesteps (no recurrence) ----
    # layer-0 slots get x(t)@wih0 + b0, layer-1 slots get b1.
    pre_ref[...] = (jnp.dot(x_ref[...], w_in, preferred_element_type=jnp.float32)
                    + bias)

    # lane mask used ONCE to zero the bogus layer-1 half produced by the prologue iter
    lane = jax.lax.broadcasted_iota(jnp.int32, (Bp, 2 * H), 1)
    mask_l0 = (lane < H).astype(jnp.float32)

    # Pipelined combined recurrence: iteration t handles layer-0 step t and
    # layer-1 step t-1. Combined state layout: lanes 0:H = layer-0, H:2H = layer-1.
    h = jnp.zeros((Bp, 2 * H), jnp.float32)     # [h0 | h1]
    c = jnp.zeros((Bp, 2 * H), jnp.float32)     # [c0 | c1]
    acc = jnp.zeros((Bp, COMB_W), jnp.float32)  # fused matmul result carried across steps

    for t in range(T1):                          # T static & tiny -> full unroll
        g_all = acc + pre_ref[t * Bp:(t + 1) * Bp, :]          # (Bp, 256)
        i = jax.nn.sigmoid(g_all[:, 0:2 * H])                  # [i0|i1]
        f = jax.nn.sigmoid(g_all[:, 2 * H:4 * H])              # [f0|f1]
        gg = jnp.tanh(g_all[:, 4 * H:6 * H])                   # [g0|g1]
        o = jax.nn.sigmoid(g_all[:, 6 * H:8 * H])              # [o0|o1]
        c = f * c + i * gg
        h = o * jnp.tanh(c)
        if t == 0:
            # prologue: layer-1 half came from bias-only gates -> force h1 = c1 = 0
            h = h * mask_l0
            c = c * mask_l0
        if t < T:
            # one fused MXU pass: layer-0(t+1) recurrent pre-gates + layer-1(t) pre-gates
            acc = jnp.dot(h, w_big, preferred_element_type=jnp.float32)

    # after the last iteration, lanes H:2H hold h1 at the final real timestep
    h1_last = h[:, H:2 * H]                                     # (Bp, H)
    out = jnp.dot(h1_last, fcw, preferred_element_type=jnp.float32) + fcb
    out_ref[...] = out[0:B, :]


def lstm_forward(x, slab):
    """x: (B, T, D) float32, batch_first like the PyTorch module."""
    B, T, D = x.shape
    Bp = BATCH_PAD
    # pad batch to 8 sublanes, feature dim to 8, and append one dummy (zero) timestep
    x_p = jnp.pad(x, ((0, Bp - B), (0, 1), (0, INPUT_DIM_PAD - D)))
    # time-major flatten, row order (t, b)
    x_tm = jnp.transpose(x_p, (1, 0, 2)).reshape((T + 1) * Bp, INPUT_DIM_PAD)

    vmem = pl.BlockSpec(memory_space=pltpu.MemorySpace.VMEM)
    return pl.pallas_call(
        lstm_kernel,
        out_shape=jax.ShapeDtypeStruct((B, OUTPUT_DIM), jnp.float32),
        in_specs=[vmem, vmem],
        out_specs=vmem,
        scratch_shapes=[pltpu.VMEM(((T + 1) * Bp, COMB_W), jnp.float32)],
    )(x_tm, slab)


def init_params(key):
    """Deterministic init mirroring nn.LSTM / nn.Linear shapes (uniform +/- 1/sqrt(H)).
    Weight matrices stored transposed: (in_features, 4*H). Gate order i,f,g,o."""
    H, D = HIDDEN_DIM, INPUT_DIM
    k = 1.0 / math.sqrt(H)
    keys = jax.random.split(key, 10)
    u = lambda kk, shape: jax.random.uniform(kk, shape, jnp.float32, -k, k)
    wih0 = u(keys[0], (D, 4 * H))
    whh0 = u(keys[1], (H, 4 * H))
    b0 = (u(keys[2], (4 * H,)) + u(keys[3], (4 * H,))).reshape(1, 4 * H)  # b_ih + b_hh
    wih1 = u(keys[4], (H, 4 * H))
    whh1 = u(keys[5], (H, 4 * H))
    b1 = (u(keys[6], (4 * H,)) + u(keys[7], (4 * H,))).reshape(1, 4 * H)
    fcw = u(keys[8], (H, OUTPUT_DIM))
    fcb = u(keys[9], (1, OUTPUT_DIM))
    return dict(wih0=wih0, whh0=whh0, b0=b0,
                wih1=wih1, whh1=whh1, b1=b1,
                fcw=fcw, fcb=fcb)


def prepare_kernel_params(p):
    """Host-side repack into one (120, 256) slab.

    Combined 256-wide gate layout (interleaved per gate group):
      cols [g*64 + 0 : g*64 + 32]  -> layer-0 gate g
      cols [g*64 + 32: g*64 + 64]  -> layer-1 gate g          (g = i, f, g, o)
    Fused recurrent weight (64, 256) block structure: [[whh0 | wih1], [0 | whh1]].
    """
    H = HIDDEN_DIM
    D = p["wih0"].shape[0]

    def slot(layer, gate):
        return slice(gate * 2 * H + layer * H, gate * 2 * H + (layer + 1) * H)

    wih0 = np.asarray(p["wih0"], np.float32)
    whh0 = np.asarray(p["whh0"], np.float32)
    wih1 = np.asarray(p["wih1"], np.float32)
    whh1 = np.asarray(p["whh1"], np.float32)
    b0 = np.asarray(p["b0"], np.float32).reshape(-1)
    b1 = np.asarray(p["b1"], np.float32).reshape(-1)
    fcw = np.asarray(p["fcw"], np.float32)
    fcb = np.asarray(p["fcb"], np.float32)

    slab = np.zeros((SLAB_ROWS, COMB_W), np.float32)
    for g in range(4):
        gs = slice(g * H, (g + 1) * H)
        slab[ROW_WIN:ROW_WIN + D, slot(0, g)] = wih0[:, gs]                 # x -> layer-0 gates
        slab[ROW_WBIG:ROW_WBIG + H, slot(0, g)] = whh0[:, gs]               # h0 -> layer-0 rec
        slab[ROW_WBIG:ROW_WBIG + H, slot(1, g)] = wih1[:, gs]               # h0 -> layer-1 input
        slab[ROW_WBIG + H:ROW_WBIG + 2 * H, slot(1, g)] = whh1[:, gs]       # h1 -> layer-1 rec
        slab[ROW_BIAS, slot(0, g)] = b0[gs]
        slab[ROW_BIAS, slot(1, g)] = b1[gs]
    slab[ROW_FCW:ROW_FCW + H, 0:OUTPUT_DIM] = fcw
    slab[ROW_FCB, 0:OUTPUT_DIM] = fcb[0]
    return jnp.asarray(slab)


def reference_forward(x, p):
    """Pure-JAX reference of the same forward pass (for correctness check)."""
    B, T, D = x.shape
    H = HIDDEN_DIM
    h0 = jnp.zeros((B, H), jnp.float32)
    c0 = jnp.zeros((B, H), jnp.float32)
    h1 = jnp.zeros((B, H), jnp.float32)
    c1 = jnp.zeros((B, H), jnp.float32)

    def cell(x_t, h, c, wih, whh, b):
        g = x_t @ wih + h @ whh + b
        i = jax.nn.sigmoid(g[:, :H])
        f = jax.nn.sigmoid(g[:, H:2 * H])
        gg = jnp.tanh(g[:, 2 * H:3 * H])
        o = jax.nn.sigmoid(g[:, 3 * H:])
        c = f * c + i * gg
        h = o * jnp.tanh(c)
        return h, c

    for t in range(T):
        h0, c0 = cell(x[:, t, :], h0, c0, p["wih0"], p["whh0"], p["b0"])
        h1, c1 = cell(h0, h1, c1, p["wih1"], p["whh1"], p["b1"])
    return h1 @ p["fcw"] + p["fcb"]


if __name__ == "__main__":
    key = jax.random.PRNGKey(0)
    k_param, k_x = jax.random.split(key)

    B, T, D = 2, 8, INPUT_DIM          # small shapes consistent with the module
    params = init_params(k_param)
    slab = prepare_kernel_params(params)
    x = jax.random.normal(k_x, (B, T, D), dtype=jnp.float32)

    out = lstm_forward(x, slab)
    out = jax.block_until_ready(out)

    ref = reference_forward(x, params)
    assert out.shape == (B, OUTPUT_DIM)
    np.testing.assert_allclose(np.asarray(out), np.asarray(ref), rtol=1e-4, atol=1e-4)

    print("KERNEL_OK")
</pallas_src>

<mosaic_0001>
module attributes {stable_mosaic.version = 11 : i64} {
  func.func @lstm_kernel(%arg0: memref<72x8xf32, #tpu.memory_space<vmem>>, %arg1: memref<120x256xf32, #tpu.memory_space<vmem>>, %arg2: memref<2x1xf32, #tpu.memory_space<vmem>>, %arg3: memref<72x256xf32, #tpu.memory_space<vmem>>) attributes {dimension_semantics = [], scalar_prefetch = 0 : i64, scratch_operands = 1 : i64, tpu.core_type = #tpu.core_type<tc>} {
    %c0 = arith.constant 0 : index
    %c0_0 = arith.constant 0 : index
    %0 = vector.load %arg1[%c0, %c0_0] : memref<120x256xf32, #tpu.memory_space<vmem>>, vector<8x256xf32>
    %c8 = arith.constant 8 : index
    %c0_1 = arith.constant 0 : index
    %1 = vector.load %arg1[%c8, %c0_1] : memref<120x256xf32, #tpu.memory_space<vmem>>, vector<64x256xf32>
    %c72 = arith.constant 72 : index
    %c0_2 = arith.constant 0 : index
    %2 = vector.load %arg1[%c72, %c0_2] : memref<120x256xf32, #tpu.memory_space<vmem>>, vector<1x256xf32>
    %c80 = arith.constant 80 : index
    %c0_3 = arith.constant 0 : index
    %3 = vector.load %arg1[%c80, %c0_3] : memref<120x256xf32, #tpu.memory_space<vmem>>, vector<32x1xf32>
    %c112 = arith.constant 112 : index
    %c0_4 = arith.constant 0 : index
    %4 = vector.load %arg1[%c112, %c0_4] : memref<120x256xf32, #tpu.memory_space<vmem>>, vector<1x1xf32>
    %c0_5 = arith.constant 0 : index
    %c0_6 = arith.constant 0 : index
    %5 = vector.load %arg0[%c0_5, %c0_6] : memref<72x8xf32, #tpu.memory_space<vmem>>, vector<72x8xf32>
    %cst = arith.constant dense<0.000000e+00> : vector<72x256xf32>
    %6 = tpu.matmul %5, %0, %cst {dimension_numbers = #tpu.dot_dimension_numbers<[1], [0], [0], [1], [0, 0, 1, 1], [], []>} : vector<72x8xf32>, vector<8x256xf32>, vector<72x256xf32> -> vector<72x256xf32>
    %7 = vector.broadcast %2 : vector<1x256xf32> to vector<72x256xf32>
    %8 = arith.addf %6, %7 : vector<72x256xf32>
    %c0_7 = arith.constant 0 : index
    %c0_8 = arith.constant 0 : index
    %9 = vector.load %arg3[%c0_7, %c0_8] : memref<72x256xf32, #tpu.memory_space<vmem>>, vector<72x256xf32>
    tpu.vector_store %arg3[%c0_7, %c0_8], %8 {strides = array<i32>} : memref<72x256xf32, #tpu.memory_space<vmem>>, vector<72x256xf32>,
    %10 = tpu.iota {dimensions = array<i32: 1>} : vector<8x64xi32>
    %c32_i32 = arith.constant 32 : i32
    %11 = vector.broadcast %c32_i32 : i32 to vector<8x64xi32>
    %12 = arith.cmpi slt, %10, %11 : vector<8x64xi32>
    %13 = arith.extui %12 : vector<8x64xi1> to vector<8x64xi32>
    %14 = arith.sitofp %13 : vector<8x64xi32> to vector<8x64xf32>
    %cst_9 = arith.constant 0.000000e+00 : f32
    %15 = vector.broadcast %cst_9 : f32 to vector<8x64xf32>
    %cst_10 = arith.constant 0.000000e+00 : f32
    %16 = vector.broadcast %cst_10 : f32 to vector<8x256xf32>
    %c0_11 = arith.constant 0 : index
    %c0_12 = arith.constant 0 : index
    %17 = vector.load %arg3[%c0_11, %c0_12] : memref<72x256xf32, #tpu.memory_space<vmem>>, vector<8x256xf32>
    %18 = arith.addf %16, %17 : vector<8x256xf32>
    %19 = vector.extract_strided_slice %18 {offsets = [0, 0], sizes = [8, 64], strides = [1, 1]} : vector<8x256xf32> to vector<8x64xf32>
    %20 = arith.negf %19 : vector<8x64xf32>
    %21 = math.exp %20 : vector<8x64xf32>
    %cst_13 = arith.constant 1.000000e+00 : f32
    %22 = vector.broadcast %cst_13 : f32 to vector<8x64xf32>
    %23 = arith.addf %22, %21 : vector<8x64xf32>
    %24 = arith.divf %22, %23 : vector<8x64xf32>
    %25 = vector.extract_strided_slice %18 {offsets = [0, 64], sizes = [8, 64], strides = [1, 1]} : vector<8x256xf32> to vector<8x64xf32>
    %26 = arith.negf %25 : vector<8x64xf32>
    %27 = math.exp %26 : vector<8x64xf32>
    %cst_14 = arith.constant 1.000000e+00 : f32
    %28 = vector.broadcast %cst_14 : f32 to vector<8x64xf32>
    %29 = arith.addf %28, %27 : vector<8x64xf32>
    %30 = arith.divf %28, %29 : vector<8x64xf32>
    %31 = vector.extract_strided_slice %18 {offsets = [0, 128], sizes = [8, 64], strides = [1, 1]} : vector<8x256xf32> to vector<8x64xf32>
    %32 = math.tanh %31 : vector<8x64xf32>
    %33 = vector.extract_strided_slice %18 {offsets = [0, 192], sizes = [8, 64], strides = [1, 1]} : vector<8x256xf32> to vector<8x64xf32>
    %34 = arith.negf %33 : vector<8x64xf32>
    %35 = math.exp %34 : vector<8x64xf32>
    %cst_15 = arith.constant 1.000000e+00 : f32
    %36 = vector.broadcast %cst_15 : f32 to vector<8x64xf32>
    %37 = arith.addf %36, %35 : vector<8x64xf32>
    %38 = arith.divf %36, %37 : vector<8x64xf32>
    %39 = arith.mulf %30, %15 : vector<8x64xf32>
    %40 = arith.mulf %24, %32 : vector<8x64xf32>
    %41 = arith.addf %39, %40 : vector<8x64xf32>
    %42 = math.tanh %41 : vector<8x64xf32>
    %43 = arith.mulf %38, %42 : vector<8x64xf32>
    %44 = arith.mulf %43, %14 : vector<8x64xf32>
    %45 = arith.mulf %41, %14 : vector<8x64xf32>
    %cst_16 = arith.constant dense<0.000000e+00> : vector<8x256xf32>
    %46 = tpu.matmul %44, %1, %cst_16 {dimension_numbers = #tpu.dot_dimension_numbers<[1], [0], [0], [1], [0, 0, 1, 1], [], []>} : vector<8x64xf32>, vector<64x256xf32>, vector<8x256xf32> -> vector<8x256xf32>
    %c8_17 = arith.constant 8 : index
    %c0_18 = arith.constant 0 : index
    %47 = vector.load %arg3[%c8_17, %c0_18] : memref<72x256xf32, #tpu.memory_space<vmem>>, vector<8x256xf32>
    %48 = arith.addf %46, %47 : vector<8x256xf32>
    %49 = vector.extract_strided_slice %48 {offsets = [0, 0], sizes = [8, 64], strides = [1, 1]} : vector<8x256xf32> to vector<8x64xf32>
    %50 = arith.negf %49 : vector<8x64xf32>
    %51 = math.exp %50 : vector<8x64xf32>
    %cst_19 = arith.constant 1.000000e+00 : f32
    %52 = vector.broadcast %cst_19 : f32 to vector<8x64xf32>
    %53 = arith.addf %52, %51 : vector<8x64xf32>
    %54 = arith.divf %52, %53 : vector<8x64xf32>
    %55 = vector.extract_strided_slice %48 {offsets = [0, 64], sizes = [8, 64], strides = [1, 1]} : vector<8x256xf32> to vector<8x64xf32>
    %56 = arith.negf %55 : vector<8x64xf32>
    %57 = math.exp %56 : vector<8x64xf32>
    %cst_20 = arith.constant 1.000000e+00 : f32
    %58 = vector.broadcast %cst_20 : f32 to vector<8x64xf32>
    %59 = arith.addf %58, %57 : vector<8x64xf32>
    %60 = arith.divf %58, %59 : vector<8x64xf32>
    %61 = vector.extract_strided_slice %48 {offsets = [0, 128], sizes = [8, 64], strides = [1, 1]} : vector<8x256xf32> to vector<8x64xf32>
    %62 = math.tanh %61 : vector<8x64xf32>
    %63 = vector.extract_strided_slice %48 {offsets = [0, 192], sizes = [8, 64], strides = [1, 1]} : vector<8x256xf32> to vector<8x64xf32>
    %64 = arith.negf %63 : vector<8x64xf32>
    %65 = math.exp %64 : vector<8x64xf32>
    %cst_21 = arith.constant 1.000000e+00 : f32
    %66 = vector.broadcast %cst_21 : f32 to vector<8x64xf32>
    %67 = arith.addf %66, %65 : vector<8x64xf32>
    %68 = arith.divf %66, %67 : vector<8x64xf32>
    %69 = arith.mulf %60, %45 : vector<8x64xf32>
    %70 = arith.mulf %54, %62 : vector<8x64xf32>
    %71 = arith.addf %69, %70 : vector<8x64xf32>
    %72 = math.tanh %71 : vector<8x64xf32>
    %73 = arith.mulf %68, %72 : vector<8x64xf32>
    %cst_22 = arith.constant dense<0.000000e+00> : vector<8x256xf32>
    %74 = tpu.matmul %73, %1, %cst_22 {dimension_numbers = #tpu.dot_dimension_numbers<[1], [0], [0], [1], [0, 0, 1, 1], [], []>} : vector<8x64xf32>, vector<64x256xf32>, vector<8x256xf32> -> vector<8x256xf32>
    %c16 = arith.constant 16 : index
    %c0_23 = arith.constant 0 : index
    %75 = vector.load %arg3[%c16, %c0_23] : memref<72x256xf32, #tpu.memory_space<vmem>>, vector<8x256xf32>
    %76 = arith.addf %74, %75 : vector<8x256xf32>
    %77 = vector.extract_strided_slice %76 {offsets = [0, 0], sizes = [8, 64], strides = [1, 1]} : vector<8x256xf32> to vector<8x64xf32>
    %78 = arith.negf %77 : vector<8x64xf32>
    %79 = math.exp %78 : vector<8x64xf32>
    %cst_24 = arith.constant 1.000000e+00 : f32
    %80 = vector.broadcast %cst_24 : f32 to vector<8x64xf32>
    %81 = arith.addf %80, %79 : vector<8x64xf32>
    %82 = arith.divf %80, %81 : vector<8x64xf32>
    %83 = vector.extract_strided_slice %76 {offsets = [0, 64], sizes = [8, 64], strides = [1, 1]} : vector<8x256xf32> to vector<8x64xf32>
    %84 = arith.negf %83 : vector<8x64xf32>
    %85 = math.exp %84 : vector<8x64xf32>
    %cst_25 = arith.constant 1.000000e+00 : f32
    %86 = vector.broadcast %cst_25 : f32 to vector<8x64xf32>
    %87 = arith.addf %86, %85 : vector<8x64xf32>
    %88 = arith.divf %86, %87 : vector<8x64xf32>
    %89 = vector.extract_strided_slice %76 {offsets = [0, 128], sizes = [8, 64], strides = [1, 1]} : vector<8x256xf32> to vector<8x64xf32>
    %90 = math.tanh %89 : vector<8x64xf32>
    %91 = vector.extract_strided_slice %76 {offsets = [0, 192], sizes = [8, 64], strides = [1, 1]} : vector<8x256xf32> to vector<8x64xf32>
    %92 = arith.negf %91 : vector<8x64xf32>
    %93 = math.exp %92 : vector<8x64xf32>
    %cst_26 = arith.constant 1.000000e+00 : f32
    %94 = vector.broadcast %cst_26 : f32 to vector<8x64xf32>
    %95 = arith.addf %94, %93 : vector<8x64xf32>
    %96 = arith.divf %94, %95 : vector<8x64xf32>
    %97 = arith.mulf %88, %71 : vector<8x64xf32>
    %98 = arith.mulf %82, %90 : vector<8x64xf32>
    %99 = arith.addf %97, %98 : vector<8x64xf32>
    %100 = math.tanh %99 : vector<8x64xf32>
    %101 = arith.mulf %96, %100 : vector<8x64xf32>
    %cst_27 = arith.constant dense<0.000000e+00> : vector<8x256xf32>
    %102 = tpu.matmul %101, %1, %cst_27 {dimension_numbers = #tpu.dot_dimension_numbers<[1], [0], [0], [1], [0, 0, 1, 1], [], []>} : vector<8x64xf32>, vector<64x256xf32>, vector<8x256xf32> -> vector<8x256xf32>
    %c24 = arith.constant 24 : index
    %c0_28 = arith.constant 0 : index
    %103 = vector.load %arg3[%c24, %c0_28] : memref<72x256xf32, #tpu.memory_space<vmem>>, vector<8x256xf32>
    %104 = arith.addf %102, %103 : vector<8x256xf32>
    %105 = vector.extract_strided_slice %104 {offsets = [0, 0], sizes = [8, 64], strides = [1, 1]} : vector<8x256xf32> to vector<8x64xf32>
    %106 = arith.negf %105 : vector<8x64xf32>
    %107 = math.exp %106 : vector<8x64xf32>
    %cst_29 = arith.constant 1.000000e+00 : f32
    %108 = vector.broadcast %cst_29 : f32 to vector<8x64xf32>
    %109 = arith.addf %108, %107 : vector<8x64xf32>
    %110 = arith.divf %108, %109 : vector<8x64xf32>
    %111 = vector.extract_strided_slice %104 {offsets = [0, 64], sizes = [8, 64], strides = [1, 1]} : vector<8x256xf32> to vector<8x64xf32>
    %112 = arith.negf %111 : vector<8x64xf32>
    %113 = math.exp %112 : vector<8x64xf32>
    %cst_30 = arith.constant 1.000000e+00 : f32
    %114 = vector.broadcast %cst_30 : f32 to vector<8x64xf32>
    %115 = arith.addf %114, %113 : vector<8x64xf32>
    %116 = arith.divf %114, %115 : vector<8x64xf32>
    %117 = vector.extract_strided_slice %104 {offsets = [0, 128], sizes = [8, 64], strides = [1, 1]} : vector<8x256xf32> to vector<8x64xf32>
    %118 = math.tanh %117 : vector<8x64xf32>
    %119 = vector.extract_strided_slice %104 {offsets = [0, 192], sizes = [8, 64], strides = [1, 1]} : vector<8x256xf32> to vector<8x64xf32>
    %120 = arith.negf %119 : vector<8x64xf32>
    %121 = math.exp %120 : vector<8x64xf32>
    %cst_31 = arith.constant 1.000000e+00 : f32
    %122 = vector.broadcast %cst_31 : f32 to vector<8x64xf32>
    %123 = arith.addf %122, %121 : vector<8x64xf32>
    %124 = arith.divf %122, %123 : vector<8x64xf32>
    %125 = arith.mulf %116, %99 : vector<8x64xf32>
    %126 = arith.mulf %110, %118 : vector<8x64xf32>
    %127 = arith.addf %125, %126 : vector<8x64xf32>
    %128 = math.tanh %127 : vector<8x64xf32>
    %129 = arith.mulf %124, %128 : vector<8x64xf32>
    %cst_32 = arith.constant dense<0.000000e+00> : vector<8x256xf32>
    %130 = tpu.matmul %129, %1, %cst_32 {dimension_numbers = #tpu.dot_dimension_numbers<[1], [0], [0], [1], [0, 0, 1, 1], [], []>} : vector<8x64xf32>, vector<64x256xf32>, vector<8x256xf32> -> vector<8x256xf32>
    %c32 = arith.constant 32 : index
    %c0_33 = arith.constant 0 : index
    %131 = vector.load %arg3[%c32, %c0_33] : memref<72x256xf32, #tpu.memory_space<vmem>>, vector<8x256xf32>
    %132 = arith.addf %130, %131 : vector<8x256xf32>
    %133 = vector.extract_strided_slice %132 {offsets = [0, 0], sizes = [8, 64], strides = [1, 1]} : vector<8x256xf32> to vector<8x64xf32>
    %134 = arith.negf %133 : vector<8x64xf32>
    %135 = math.exp %134 : vector<8x64xf32>
    %cst_34 = arith.constant 1.000000e+00 : f32
    %136 = vector.broadcast %cst_34 : f32 to vector<8x64xf32>
    %137 = arith.addf %136, %135 : vector<8x64xf32>
    %138 = arith.divf %136, %137 : vector<8x64xf32>
    %139 = vector.extract_strided_slice %132 {offsets = [0, 64], sizes = [8, 64], strides = [1, 1]} : vector<8x256xf32> to vector<8x64xf32>
    %140 = arith.negf %139 : vector<8x64xf32>
    %141 = math.exp %140 : vector<8x64xf32>
    %cst_35 = arith.constant 1.000000e+00 : f32
    %142 = vector.broadcast %cst_35 : f32 to vector<8x64xf32>
    %143 = arith.addf %142, %141 : vector<8x64xf32>
    %144 = arith.divf %142, %143 : vector<8x64xf32>
    %145 = vector.extract_strided_slice %132 {offsets = [0, 128], sizes = [8, 64], strides = [1, 1]} : vector<8x256xf32> to vector<8x64xf32>
    %146 = math.tanh %145 : vector<8x64xf32>
    %147 = vector.extract_strided_slice %132 {offsets = [0, 192], sizes = [8, 64], strides = [1, 1]} : vector<8x256xf32> to vector<8x64xf32>
    %148 = arith.negf %147 : vector<8x64xf32>
    %149 = math.exp %148 : vector<8x64xf32>
    %cst_36 = arith.constant 1.000000e+00 : f32
    %150 = vector.broadcast %cst_36 : f32 to vector<8x64xf32>
    %151 = arith.addf %150, %149 : vector<8x64xf32>
    %152 = arith.divf %150, %151 : vector<8x64xf32>
    %153 = arith.mulf %144, %127 : vector<8x64xf32>
    %154 = arith.mulf %138, %146 : vector<8x64xf32>
    %155 = arith.addf %153, %154 : vector<8x64xf32>
    %156 = math.tanh %155 : vector<8x64xf32>
    %157 = arith.mulf %152, %156 : vector<8x64xf32>
    %cst_37 = arith.constant dense<0.000000e+00> : vector<8x256xf32>
    %158 = tpu.matmul %157, %1, %cst_37 {dimension_numbers = #tpu.dot_dimension_numbers<[1], [0], [0], [1], [0, 0, 1, 1], [], []>} : vector<8x64xf32>, vector<64x256xf32>, vector<8x256xf32> -> vector<8x256xf32>
    %c40 = arith.constant 40 : index
    %c0_38 = arith.constant 0 : index
    %159 = vector.load %arg3[%c40, %c0_38] : memref<72x256xf32, #tpu.memory_space<vmem>>, vector<8x256xf32>
    %160 = arith.addf %158, %159 : vector<8x256xf32>
    %161 = vector.extract_strided_slice %160 {offsets = [0, 0], sizes = [8, 64], strides = [1, 1]} : vector<8x256xf32> to vector<8x64xf32>
    %162 = arith.negf %161 : vector<8x64xf32>
    %163 = math.exp %162 : vector<8x64xf32>
    %cst_39 = arith.constant 1.000000e+00 : f32
    %164 = vector.broadcast %cst_39 : f32 to vector<8x64xf32>
    %165 = arith.addf %164, %163 : vector<8x64xf32>
    %166 = arith.divf %164, %165 : vector<8x64xf32>
    %167 = vector.extract_strided_slice %160 {offsets = [0, 64], sizes = [8, 64], strides = [1, 1]} : vector<8x256xf32> to vector<8x64xf32>
    %168 = arith.negf %167 : vector<8x64xf32>
    %169 = math.exp %168 : vector<8x64xf32>
    %cst_40 = arith.constant 1.000000e+00 : f32
    %170 = vector.broadcast %cst_40 : f32 to vector<8x64xf32>
    %171 = arith.addf %170, %169 : vector<8x64xf32>
    %172 = arith.divf %170, %171 : vector<8x64xf32>
    %173 = vector.extract_strided_slice %160 {offsets = [0, 128], sizes = [8, 64], strides = [1, 1]} : vector<8x256xf32> to vector<8x64xf32>
    %174 = math.tanh %173 : vector<8x64xf32>
    %175 = vector.extract_strided_slice %160 {offsets = [0, 192], sizes = [8, 64], strides = [1, 1]} : vector<8x256xf32> to vector<8x64xf32>
    %176 = arith.negf %175 : vector<8x64xf32>
    %177 = math.exp %176 : vector<8x64xf32>
    %cst_41 = arith.constant 1.000000e+00 : f32
    %178 = vector.broadcast %cst_41 : f32 to vector<8x64xf32>
    %179 = arith.addf %178, %177 : vector<8x64xf32>
    %180 = arith.divf %178, %179 : vector<8x64xf32>
    %181 = arith.mulf %172, %155 : vector<8x64xf32>
    %182 = arith.mulf %166, %174 : vector<8x64xf32>
    %183 = arith.addf %181, %182 : vector<8x64xf32>
    %184 = math.tanh %183 : vector<8x64xf32>
    %185 = arith.mulf %180, %184 : vector<8x64xf32>
    %cst_42 = arith.constant dense<0.000000e+00> : vector<8x256xf32>
    %186 = tpu.matmul %185, %1, %cst_42 {dimension_numbers = #tpu.dot_dimension_numbers<[1], [0], [0], [1], [0, 0, 1, 1], [], []>} : vector<8x64xf32>, vector<64x256xf32>, vector<8x256xf32> -> vector<8x256xf32>
    %c48 = arith.constant 48 : index
    %c0_43 = arith.constant 0 : index
    %187 = vector.load %arg3[%c48, %c0_43] : memref<72x256xf32, #tpu.memory_space<vmem>>, vector<8x256xf32>
    %188 = arith.addf %186, %187 : vector<8x256xf32>
    %189 = vector.extract_strided_slice %188 {offsets = [0, 0], sizes = [8, 64], strides = [1, 1]} : vector<8x256xf32> to vector<8x64xf32>
    %190 = arith.negf %189 : vector<8x64xf32>
    %191 = math.exp %190 : vector<8x64xf32>
    %cst_44 = arith.constant 1.000000e+00 : f32
    %192 = vector.broadcast %cst_44 : f32 to vector<8x64xf32>
    %193 = arith.addf %192, %191 : vector<8x64xf32>
    %194 = arith.divf %192, %193 : vector<8x64xf32>
    %195 = vector.extract_strided_slice %188 {offsets = [0, 64], sizes = [8, 64], strides = [1, 1]} : vector<8x256xf32> to vector<8x64xf32>
    %196 = arith.negf %195 : vector<8x64xf32>
    %197 = math.exp %196 : vector<8x64xf32>
    %cst_45 = arith.constant 1.000000e+00 : f32
    %198 = vector.broadcast %cst_45 : f32 to vector<8x64xf32>
    %199 = arith.addf %198, %197 : vector<8x64xf32>
    %200 = arith.divf %198, %199 : vector<8x64xf32>
    %201 = vector.extract_strided_slice %188 {offsets = [0, 128], sizes = [8, 64], strides = [1, 1]} : vector<8x256xf32> to vector<8x64xf32>
    %202 = math.tanh %201 : vector<8x64xf32>
    %203 = vector.extract_strided_slice %188 {offsets = [0, 192], sizes = [8, 64], strides = [1, 1]} : vector<8x256xf32> to vector<8x64xf32>
    %204 = arith.negf %203 : vector<8x64xf32>
    %205 = math.exp %204 : vector<8x64xf32>
    %cst_46 = arith.constant 1.000000e+00 : f32
    %206 = vector.broadcast %cst_46 : f32 to vector<8x64xf32>
    %207 = arith.addf %206, %205 : vector<8x64xf32>
    %208 = arith.divf %206, %207 : vector<8x64xf32>
    %209 = arith.mulf %200, %183 : vector<8x64xf32>
    %210 = arith.mulf %194, %202 : vector<8x64xf32>
    %211 = arith.addf %209, %210 : vector<8x64xf32>
    %212 = math.tanh %211 : vector<8x64xf32>
    %213 = arith.mulf %208, %212 : vector<8x64xf32>
    %cst_47 = arith.constant dense<0.000000e+00> : vector<8x256xf32>
    %214 = tpu.matmul %213, %1, %cst_47 {dimension_numbers = #tpu.dot_dimension_numbers<[1], [0], [0], [1], [0, 0, 1, 1], [], []>} : vector<8x64xf32>, vector<64x256xf32>, vector<8x256xf32> -> vector<8x256xf32>
    %c56 = arith.constant 56 : index
    %c0_48 = arith.constant 0 : index
    %215 = vector.load %arg3[%c56, %c0_48] : memref<72x256xf32, #tpu.memory_space<vmem>>, vector<8x256xf32>
    %216 = arith.addf %214, %215 : vector<8x256xf32>
    %217 = vector.extract_strided_slice %216 {offsets = [0, 0], sizes = [8, 64], strides = [1, 1]} : vector<8x256xf32> to vector<8x64xf32>
    %218 = arith.negf %217 : vector<8x64xf32>
    %219 = math.exp %218 : vector<8x64xf32>
    %cst_49 = arith.constant 1.000000e+00 : f32
    %220 = vector.broadcast %cst_49 : f32 to vector<8x64xf32>
    %221 = arith.addf %220, %219 : vector<8x64xf32>
    %222 = arith.divf %220, %221 : vector<8x64xf32>
    %223 = vector.extract_strided_slice %216 {offsets = [0, 64], sizes = [8, 64], strides = [1, 1]} : vector<8x256xf32> to vector<8x64xf32>
    %224 = arith.negf %223 : vector<8x64xf32>
    %225 = math.exp %224 : vector<8x64xf32>
    %cst_50 = arith.constant 1.000000e+00 : f32
    %226 = vector.broadcast %cst_50 : f32 to vector<8x64xf32>
    %227 = arith.addf %226, %225 : vector<8x64xf32>
    %228 = arith.divf %226, %227 : vector<8x64xf32>
    %229 = vector.extract_strided_slice %216 {offsets = [0, 128], sizes = [8, 64], strides = [1, 1]} : vector<8x256xf32> to vector<8x64xf32>
    %230 = math.tanh %229 : vector<8x64xf32>
    %231 = vector.extract_strided_slice %216 {offsets = [0, 192], sizes = [8, 64], strides = [1, 1]} : vector<8x256xf32> to vector<8x64xf32>
    %232 = arith.negf %231 : vector<8x64xf32>
    %233 = math.exp %232 : vector<8x64xf32>
    %cst_51 = arith.constant 1.000000e+00 : f32
    %234 = vector.broadcast %cst_51 : f32 to vector<8x64xf32>
    %235 = arith.addf %234, %233 : vector<8x64xf32>
    %236 = arith.divf %234, %235 : vector<8x64xf32>
    %237 = arith.mulf %228, %211 : vector<8x64xf32>
    %238 = arith.mulf %222, %230 : vector<8x64xf32>
    %239 = arith.addf %237, %238 : vector<8x64xf32>
    %240 = math.tanh %239 : vector<8x64xf32>
    %241 = arith.mulf %236, %240 : vector<8x64xf32>
    %cst_52 = arith.constant dense<0.000000e+00> : vector<8x256xf32>
    %242 = tpu.matmul %241, %1, %cst_52 {dimension_numbers = #tpu.dot_dimension_numbers<[1], [0], [0], [1], [0, 0, 1, 1], [], []>} : vector<8x64xf32>, vector<64x256xf32>, vector<8x256xf32> -> vector<8x256xf32>
    %c64 = arith.constant 64 : index
    %c0_53 = arith.constant 0 : index
    %243 = vector.load %arg3[%c64, %c0_53] : memref<72x256xf32, #tpu.memory_space<vmem>>, vector<8x256xf32>
    %244 = arith.addf %242, %243 : vector<8x256xf32>
    %245 = vector.extract_strided_slice %244 {offsets = [0, 0], sizes = [8, 64], strides = [1, 1]} : vector<8x256xf32> to vector<8x64xf32>
    %246 = arith.negf %245 : vector<8x64xf32>
    %247 = math.exp %246 : vector<8x64xf32>
    %cst_54 = arith.constant 1.000000e+00 : f32
    %248 = vector.broadcast %cst_54 : f32 to vector<8x64xf32>
    %249 = arith.addf %248, %247 : vector<8x64xf32>
    %250 = arith.divf %248, %249 : vector<8x64xf32>
    %251 = vector.extract_strided_slice %244 {offsets = [0, 64], sizes = [8, 64], strides = [1, 1]} : vector<8x256xf32> to vector<8x64xf32>
    %252 = arith.negf %251 : vector<8x64xf32>
    %253 = math.exp %252 : vector<8x64xf32>
    %cst_55 = arith.constant 1.000000e+00 : f32
    %254 = vector.broadcast %cst_55 : f32 to vector<8x64xf32>
    %255 = arith.addf %254, %253 : vector<8x64xf32>
    %256 = arith.divf %254, %255 : vector<8x64xf32>
    %257 = vector.extract_strided_slice %244 {offsets = [0, 128], sizes = [8, 64], strides = [1, 1]} : vector<8x256xf32> to vector<8x64xf32>
    %258 = math.tanh %257 : vector<8x64xf32>
    %259 = vector.extract_strided_slice %244 {offsets = [0, 192], sizes = [8, 64], strides = [1, 1]} : vector<8x256xf32> to vector<8x64xf32>
    %260 = arith.negf %259 : vector<8x64xf32>
    %261 = math.exp %260 : vector<8x64xf32>
    %cst_56 = arith.constant 1.000000e+00 : f32
    %262 = vector.broadcast %cst_56 : f32 to vector<8x64xf32>
    %263 = arith.addf %262, %261 : vector<8x64xf32>
    %264 = arith.divf %262, %263 : vector<8x64xf32>
    %265 = arith.mulf %256, %239 : vector<8x64xf32>
    %266 = arith.mulf %250, %258 : vector<8x64xf32>
    %267 = arith.addf %265, %266 : vector<8x64xf32>
    %268 = math.tanh %267 : vector<8x64xf32>
    %269 = arith.mulf %264, %268 : vector<8x64xf32>
    %270 = vector.extract_strided_slice %269 {offsets = [0, 32], sizes = [8, 32], strides = [1, 1]} : vector<8x64xf32> to vector<8x32xf32>
    %cst_57 = arith.constant dense<0.000000e+00> : vector<8x1xf32>
    %271 = tpu.matmul %270, %3, %cst_57 {dimension_numbers = #tpu.dot_dimension_numbers<[1], [0], [0], [1], [0, 0, 1, 1], [], []>} : vector<8x32xf32>, vector<32x1xf32>, vector<8x1xf32> -> vector<8x1xf32>
    %272 = vector.broadcast %4 : vector<1x1xf32> to vector<8x1xf32>
    %273 = arith.addf %271, %272 : vector<8x1xf32>
    %274 = vector.extract_strided_slice %273 {offsets = [0, 0], sizes = [2, 1], strides = [1, 1]} : vector<8x1xf32> to vector<2x1xf32>
    %c0_58 = arith.constant 0 : index
    %c0_59 = arith.constant 0 : index
    %275 = vector.load %arg2[%c0_58, %c0_59] : memref<2x1xf32, #tpu.memory_space<vmem>>, vector<2x1xf32>
    tpu.vector_store %arg2[%c0_58, %c0_59], %274 {strides = array<i32>} : memref<2x1xf32, #tpu.memory_space<vmem>>, vector<2x1xf32>,
    return
  }
}

</mosaic_0001>

<bundles_post_ra>
// kernel: tpu_custom_call.1
= control target key start
LH: loop header
LB: loop body
LE: loop exit
PB: predicated region body
PF: predicated region fallthrough
CT: control target
= control target key end

     0   :  { %7 = vsyncpa [#allocation4], 0  ;;  %s1346_s9 = smov [#allocation3]   ;;  %s1680_s0 = inlined_call_operand.vmem [shape: f32[72,8], index: 0, kind: input, shape index: {}]   ;;  %s1681_s1 = inlined_call_operand.hbm [shape: f32[120,256], index: 1, kind: input, shape index: {}]   ;;  %s1682_s2 = inlined_call_operand.vmem [shape: f32[2,1], index: 2, kind: output, shape index: {}]  }
   0x1   :  { %s15_s10 = sshll.u32 %s1346_s9, 4  ;;  %s16_s10 = int_to_ptr.vmem [resolvable:$true] %s15_s10 }
   0x2   :  { %s1332_s11 = scalar_lea.vmem %s16_s10, 3840  ;;  %p1337_p1 = scmp.lt.s32.totalorder %s16_s10, %s16_s10 }
   0x3   :  { %p1333_p0 = scmp.ne.s32.totalorder %s16_s10, %s1332_s11  ;;  %p1338_p2 = scmp.lt.s32.totalorder %s1332_s11, %s1332_s11 }
   0x5   :  { %p1339_p3 = por %p1338_p2, %p1337_p1 }
   0x7   :  { %p1340_p4 = pnand %p1339_p3, %p1333_p0 }
   0x9   :  { %1343 = shalt.err (!%p1340_p4)
}
   0xa   :  { %s1347_s12 = smov 256   ;;  %s1348_s13 = smov 16  }
   0xb   :  { %21 = dma.hbm_to_vmem [thread:$0]  %s1681_s1, 3840, %s16_s10, [#allocation4], %s1347_s12, %s1347_s12, %s1348_s13  }
   0xc   :  { %1344 = dma.done.wait [#allocation4], 3840  }
   0xd   :  { %1345 = vsyncadd [#allocation4], 4294963456  ;;  %v1349_v0 = vmov 0.0   ;;  %v26_v1 = vld [vmem:[#allocation3 + $0x8] sm:$0xff]  ;;  %v25_v2 = vld [vmem:[#allocation3] sm:$0xff]  ;;  %vm70_vm0 = vcmask 64512   ;;  %v60_v4 = vlaneseq }
   0xe   :  { %162 = vmatprep.mubr.f32.mxu0 %v1349_v0  ;;  %344 = vmatprep.mubr.f32.mxu1 %v1349_v0  ;;  %v50_v3 = vld [vmem:[%s1680_s0] sm:$0xff]  ;;  %v44_v7 = vld [vmem:[#allocation3 + $0x90] ss:$8 sm:$0x3]  ;;  %s1350_s1 = smov 64   ;;  %v1393_v23 = vld [vmem:[#allocation3 + $0x88] sm:$0xff] }
   0xf   :  { %128 = vmatprep.subr.mxu0 %v26_v1  ;;  %v61_v5 = vshrl.u32 %v60_v4, 7  ;;  %v236_v18 = vand.u32 127, %v60_v4  ;;  %v1395_v24 = vld [vmem:[#allocation3 + $0x80] sm:$0xff]  ;;  %v1397_v25 = vld [vmem:[#allocation3 + $0x78] sm:$0xff]  ;;  %296 = vmatprep.subr.mxu1 %v1393_v23  ;;  %v1400_v26 = vld [vmem:[#allocation3 + $0x70] sm:$0xff]  ;;  %vm277_vm2 = vcmask 523264  }
  0x10   :  { %129 = vmatpush1.msra.mxu0 %v25_v2  ;;  %297 = vmatpush1.msra.mxu1 %v1395_v24  ;;  %v1404_v27 = vld [vmem:[#allocation3 + $0x68] sm:$0xff]  ;;  %v1408_v28 = vld [vmem:[#allocation3 + $0x60] sm:$0xff]  ;;  %v1412_v29 = vld [vmem:[#allocation3 + $0x58] sm:$0xff]  ;;  %vm1351_vm3 = vmmov 0   ;;  %vm1076_vm4 = vcmask 261120   ;;  %vm1149_vm5 = vcmask 1024  }
  0x11   :  { %1156 = vmatmul.mubr.msk.f32.vlgmr.msra.gmra.mxu0 %vm70_vm0, %v50_v3  ;;  %v62_v6 = vsub.s32 0, %v61_v5  ;;  %v66_v12 = vsub.s32 1, %v61_v5  ;;  %vm237_vm1 = vcmp.lt.s32.totalorder %v236_v18, 32  ;;  %496 = vmatprep.subr.mxu0 %v1393_v23  ;;  %v51_v30 = vld [vmem:[%s1680_s0 + $0x8] sm:$0xff]  ;;  %v1419_v31 = vld [vmem:[#allocation3 + $0x50] sm:$0xff]  ;;  %v1427_v33 = vld [vmem:[#allocation3 + $0x40] sm:$0xff] }
  0x12   :  { %168 = vmatprep.mubr.f32.mxu0 %v1349_v0  ;;  %v1165_v22 = vsel %vm237_vm1, 1.0, %v1349_v0  ;;  %497 = vmatpush1.msra.mxu0 %v1395_v24  ;;  %v1423_v32 = vld [vmem:[#allocation3 + $0x48] sm:$0xff]  ;;  %v1431_v34 = vld [vmem:[#allocation3 + $0x38] sm:$0xff]  ;;  %v1435_v35 = vld [vmem:[#allocation3 + $0x30] sm:$0xff] }
  0x13   :  { %v1378_v8 = vrot.slane %v44_v7, %v62_v6  ;;  %v1381_v13 = vrot.slane %v44_v7, %v66_v12  ;;  %298 = vmatprep.subr.mxu1 %v1397_v25  ;;  %498 = vmatprep.subr.mxu0 %v1397_v25  ;;  %v1439_v36 = vld [vmem:[#allocation3 + $0x28] sm:$0xff]  ;;  %v1443_v37 = vld [vmem:[#allocation3 + $0x20] sm:$0xff]  ;;  %v1447_v38 = vld [vmem:[#allocation3 + $0x18] sm:$0xff] }
  0x14   :  { %299 = vmatpush1.msra.mxu1 %v1400_v26  ;;  %499 = vmatpush1.msra.mxu0 %v1400_v26  ;;  %v1451_v39 = vld [vmem:[#allocation3 + $0x10] sm:$0xff] }
  0x15   :  { %300 = vmatprep.subr.mxu1 %v1404_v27  ;;  %1157 = vmatmul.mubr.msk.f32.gmra.mxu0 %vm70_vm0, %v51_v30  ;;  %v52_v5 = vld [vmem:[%s1680_s0 + $0x10] sm:$0xff] }
  0x16   :  { %301 = vmatpush1.msra.mxu1 %v1408_v28  ;;  %174 = vmatprep.mubr.f32.mxu0 %v1349_v0 }
  0x17   :  { %302 = vmatprep.subr.mxu1 %v1412_v29  ;;  %500 = vmatprep.subr.mxu0 %v1404_v27 }
  0x18   :  { %303 = vmatpush1.msra.mxu1 %v1419_v31  ;;  %501 = vmatpush1.msra.mxu0 %v1408_v28 }
  0x19   :  { %304 = vmatprep.subr.mxu1 %v1423_v32  ;;  %502 = vmatprep.subr.mxu0 %v1412_v29 }
  0x1a   :  { %305 = vmatpush1.msra.mxu1 %v1427_v33  ;;  %503 = vmatpush1.msra.mxu0 %v1419_v31 }
  0x1b   :  { %306 = vmatprep.subr.mxu1 %v1431_v34  ;;  %504 = vmatprep.subr.mxu0 %v1423_v32 }
  0x1c   :  { %307 = vmatpush1.msra.mxu1 %v1435_v35  ;;  %505 = vmatpush1.msra.mxu0 %v1427_v33 }
  0x1d   :  { %308 = vmatprep.subr.mxu1 %v1439_v36  ;;  %506 = vmatprep.subr.mxu0 %v1431_v34 }
  0x1e   :  { %309 = vmatpush1.msra.mxu1 %v1443_v37  ;;  %507 = vmatpush1.msra.mxu0 %v1435_v35 }
  0x1f   :  { %310 = vmatprep.subr.mxu1 %v1447_v38  ;;  %508 = vmatprep.subr.mxu0 %v1439_v36 }
  0x20   :  { %311 = vmatpush1.msra.mxu1 %v1451_v39  ;;  %509 = vmatpush1.msra.mxu0 %v1443_v37 }
  0x21   :  { %396 = vmatprep.subr.mxu1 %v1393_v23  ;;  %510 = vmatprep.subr.mxu0 %v1447_v38 }
  0x22   :  { %511 = vmatpush1.msra.mxu0 %v1451_v39 }
  0x23   :  { %696 = vmatprep.subr.mxu0 %v1393_v23  ;;  %1158 = vmatmul.mubr.msk.f32.gmra.mxu0 %vm70_vm0, %v52_v5 }
  0x24   :  { %180 = vmatprep.mubr.f32.mxu0 %v1349_v0 }
  0xd1   :  { %v164_v9 = vpop.f32.mrf.mxu0 }
  0xd2   :  { %v165_v10 = vadd.f32 %v164_v9, %v1378_v8 }
  0xd3   :  { %v166_v14 = vpop.f32.mrf.mxu0 }
  0xd4   :  { %v1166_v11 = vmul.f32 -1.442695, %v165_v10  ;;  %v1384_v15 = vadd.f32 %v166_v14, %v1381_v13 }
  0xd5   :  { %v170_v52 = vpop.f32.mrf.mxu0 }
  0xd6   :  { %1216 = vpow2.f32 %v1166_v11  ;;  %v1167_v40 = vmul.f32 -1.442695, %v1384_v15  ;;  %v171_v53 = vadd.f32 %v170_v52, %v1378_v8  ;;  %v58_v52 = vld [vmem:[%s1680_s0 + $0x40] sm:$0xff] }
  0xd7   :  { %1218 = vtanh.f32 %v1384_v15  ;;  %v172_v57 = vpop.f32.mrf.mxu0 }
  0xd8   :  { %v173_v59 = vadd.f32 %v172_v57, %v1381_v13 }
  0xe3   :  { %v1217_v16 = vpop.eup %1216 }
  0xe4   :  { %v247_v17 = vadd.f32 1.0, %v1217_v16  ;;  %v1219_v19 = vpop.eup %1218 }
  0xe6   :  { %1220 = vrcp.f32 %v247_v17  ;;  %v176_v17 = vpop.f32.mrf.mxu0 }
  0xe7   :  { %1222 = vpow2.f32 %v1167_v40  ;;  %v177_v18 = vadd.f32 %v176_v17, %v1378_v8 }
  0xf3   :  { %v1387_v20 = vpop.eup %1220 }
  0xf4   :  { %v258_v21 = vmul.f32 %v1387_v20, %v1219_v19  ;;  %v1223_v41 = vpop.eup %1222  ;;  %v257_v43 = vmul.f32 0.0, %v1387_v20 }
  0xf5   :  { %v254_v42 = vadd.f32 1.0, %v1223_v41 }
  0xf6   :  { %260 = vrot.lane.b32.xlu0 %v258_v21, %s1350_s1 }
  0xf7   :  { %1224 = vrcp.f32 %v254_v42 }
  0xfa   :  { %267 = vrot.lane.b32.xlu0 %v1165_v22, %s1350_s1  ;;  %v178_v22 = vpop.f32.mrf.mxu0 }
  0xfb   :  { %v179_v40 = vadd.f32 %v178_v22, %v1381_v13 }
 0x104   :  { %v1225_v46 = vpop.eup %1224 }
 0x168   :  { %v261_v44 = vpop.permute.xlu0 %260 }
 0x169   :  { %v263_v45 = vadd.f32 %v261_v44, %v257_v43 }
 0x16b   :  { %1226 = vtanh.f32 %v263_v45 }
 0x16c   :  { %v268_v49 = vpop.permute.xlu0 %267 }
 0x16d   :  { %v271_v1 = vmul.f32 %v268_v49, %v263_v45 }
 0x178   :  { %v1227_v47 = vpop.eup %1226 }
 0x179   :  { %v265_v48 = vmul.f32 %v1227_v47, %v1225_v46  ;;  %v53_v47 = vld [vmem:[%s1680_s0 + $0x18] sm:$0xff] }
 0x17a   :  { %1159 = vmatmul.mubr.msk.f32.gmra.mxu0 %vm70_vm0, %v53_v47 }
 0x17b   :  { %v270_v50 = vmul.f32 %v268_v49, %v265_v48  ;;  %186 = vmatprep.mubr.f32.mxu0 %v1349_v0  ;;  %v54_v48 = vld [vmem:[%s1680_s0 + $0x20] sm:$0xff]  ;;  %v55_v49 = vld [vmem:[%s1680_s0 + $0x28] sm:$0xff] }
 0x17d   :  { %275 = vrot.lane.b32.xlu1 %v270_v50, %s1350_s1  ;;  %v56_v50 = vld [vmem:[%s1680_s0 + $0x30] sm:$0xff] }
 0x17e   :  { %1160 = vmatmul.mubr.msk.f32.gmra.mxu0 %vm70_vm0, %v54_v48 }
 0x17f   :  { %192 = vmatprep.mubr.f32.mxu0 %v1349_v0 }
 0x182   :  { %1161 = vmatmul.mubr.msk.f32.gmra.mxu0 %vm70_vm0, %v55_v49 }
 0x183   :  { %198 = vmatprep.mubr.f32.mxu0 %v1349_v0 }
 0x186   :  { %1162 = vmatmul.mubr.msk.f32.gmra.mxu0 %vm70_vm0, %v56_v50 }
 0x187   :  { %204 = vmatprep.mubr.f32.mxu0 %v1349_v0 }
 0x1ef   :  { %v276_v51 = vpop.permute.xlu1 %275 }
 0x1f0   :  { %1168 = vmatmul.mubr.msk.f32.vlgmr.msra.gmra.mxu1 %vm277_vm2, %v276_v51  ;;  %v57_v51 = vld [vmem:[%s1680_s0 + $0x38] sm:$0xff]  ;;  %s1352_s0 = smov 32  }
 0x1f1   :  { %397 = vmatpush1.msra.mxu1 %v1395_v24  ;;  %444 = vmatprep.mubr.f32.mxu1 %v1349_v0 }
 0x1f2   :  { %398 = vmatprep.subr.mxu1 %v1397_v25  ;;  %1163 = vmatmul.mubr.msk.f32.gmra.mxu0 %vm70_vm0, %v57_v51 }
 0x1f3   :  { %399 = vmatpush1.msra.mxu1 %v1400_v26  ;;  %210 = vmatprep.mubr.f32.mxu0 %v1349_v0 }
 0x1f4   :  { %400 = vmatprep.subr.mxu1 %v1404_v27 }
 0x1f5   :  { %401 = vmatpush1.msra.mxu1 %v1408_v28 }
 0x1f6   :  { %402 = vmatprep.subr.mxu1 %v1412_v29  ;;  %1164 = vmatmul.mubr.msk.f32.gmra.mxu0 %vm70_vm0, %v58_v52 }
 0x1f7   :  { %403 = vmatpush1.msra.mxu1 %v1419_v31  ;;  %544 = vmatprep.mubr.f32.mxu0 %v1349_v0 }
 0x1f8   :  { %404 = vmatprep.subr.mxu1 %v1423_v32 }
 0x1f9   :  { %405 = vmatpush1.msra.mxu1 %v1427_v33 }
 0x1fa   :  { %406 = vmatprep.subr.mxu1 %v1431_v34 }
 0x1fb   :  { %407 = vmatpush1.msra.mxu1 %v1435_v35 }
 0x1fc   :  { %408 = vmatprep.subr.mxu1 %v1439_v36 }
 0x1fd   :  { %409 = vmatpush1.msra.mxu1 %v1443_v37 }
 0x1fe   :  { %410 = vmatprep.subr.mxu1 %v1447_v38 }
 0x1ff   :  { %411 = vmatpush1.msra.mxu1 %v1451_v39 }
 0x200   :  { %596 = vmatprep.subr.mxu1 %v1393_v23 }
 0x2b0   :  { %v346_v54 = vpop.f32.mrf.mxu1 }
 0x2b1   :  { %v347_v55 = vadd.f32 %v346_v54, %v171_v53 }
 0x2b2   :  { %v348_v58 = vpop.f32.mrf.mxu1 }
 0x2b3   :  { %v1169_v56 = vmul.f32 -1.442695, %v347_v55  ;;  %v349_v60 = vadd.f32 %v348_v58, %v173_v59 }
 0x2b5   :  { %1228 = vpow2.f32 %v1169_v56  ;;  %v1170_v6 = vmul.f32 -1.442695, %v349_v60 }
 0x2b6   :  { %1230 = vtanh.f32 %v349_v60 }
 0x2c2   :  { %v1229_v61 = vpop.eup %1228 }
 0x2c3   :  { %v354_v62 = vadd.f32 1.0, %v1229_v61  ;;  %v1231_v63 = vpop.eup %1230 }
 0x2c5   :  { %1232 = vrcp.f32 %v354_v62 }
 0x2c6   :  { %1234 = vpow2.f32 %v1170_v6 }
 0x2d2   :  { %v1233_v2 = vpop.eup %1232 }
 0x2d3   :  { %v365_v3 = vmul.f32 %v1233_v2, %v1231_v63  ;;  %v364_v4 = vmul.f32 %v1233_v2, %v271_v1  ;;  %v1235_v7 = vpop.eup %1234  ;;  %v182_v63 = vpop.f32.mrf.mxu0 }
 0x2d4   :  { %v361_v9 = vadd.f32 1.0, %v1235_v7 }
 0x2d5   :  { %367 = vrot.lane.b32.xlu1 %v365_v3, %s1350_s1  ;;  %v184_v1 = vpop.f32.mrf.mxu0 }
 0x2d6   :  { %1236 = vrcp.f32 %v361_v9 }
 0x2d7   :  { %v188_v2 = vpop.f32.mrf.mxu0 }
 0x2d8   :  { %v189_v52 = vadd.f32 %v188_v2, %v1378_v8 }
 0x2d9   :  { %v1568_v3 = vpop.f32.mrf.mxu0 }
 0x2e3   :  { %v1237_v12 = vpop.eup %1236 }
 0x347   :  { %v368_v10 = vpop.permute.xlu1 %367 }
 0x348   :  { %v1493_v11 = vadd.f32 %v368_v10, %v364_v4  ;;  %v1570_v4 = vpop.f32.mrf.mxu0 }
 0x34a   :  { %1238 = vtanh.f32 %v1493_v11  ;;  %v1572_v5 = vpop.f32.mrf.mxu0 }
 0x34c   :  { %v1574_v6 = vpop.f32.mrf.mxu0 }
 0x34e   :  { %v1576_v7 = vpop.f32.mrf.mxu0 }
 0x350   :  { %v1578_v9 = vpop.f32.mrf.mxu0 }
 0x352   :  { %v1580_v10 = vpop.f32.mrf.mxu0 }
 0x357   :  { %v1239_v14 = vpop.eup %1238 }
 0x358   :  { %v372_v15 = vmul.f32 %v1239_v14, %v1237_v12  ;;  %v183_v14 = vadd.f32 %v182_v63, %v1378_v8 }
 0x35a   :  { %376 = vrot.lane.b32.xlu0 %v372_v15, %s1350_s1 }
 0x3cc   :  { %v377_v16 = vpop.permute.xlu0 %376 }
 0x3cd   :  { %1171 = vmatmul.mubr.msk.f32.vlgmr.msra.gmra.mxu1 %vm277_vm2, %v377_v16 }
 0x3ce   :  { %597 = vmatpush1.msra.mxu1 %v1395_v24  ;;  %644 = vmatprep.mubr.f32.mxu1 %v1349_v0 }
 0x3cf   :  { %598 = vmatprep.subr.mxu1 %v1397_v25 }
 0x3d0   :  { %599 = vmatpush1.msra.mxu1 %v1400_v26 }
 0x3d1   :  { %600 = vmatprep.subr.mxu1 %v1404_v27 }
 0x3d2   :  { %601 = vmatpush1.msra.mxu1 %v1408_v28 }
 0x3d3   :  { %602 = vmatprep.subr.mxu1 %v1412_v29 }
 0x3d4   :  { %603 = vmatpush1.msra.mxu1 %v1419_v31 }
 0x3d5   :  { %604 = vmatprep.subr.mxu1 %v1423_v32 }
 0x3d6   :  { %605 = vmatpush1.msra.mxu1 %v1427_v33 }
 0x3d7   :  { %606 = vmatprep.subr.mxu1 %v1431_v34 }
 0x3d8   :  { %607 = vmatpush1.msra.mxu1 %v1435_v35 }
 0x3d9   :  { %608 = vmatprep.subr.mxu1 %v1439_v36 }
 0x3da   :  { %609 = vmatpush1.msra.mxu1 %v1443_v37 }
 0x3db   :  { %610 = vmatprep.subr.mxu1 %v1447_v38 }
 0x3dc   :  { %611 = vmatpush1.msra.mxu1 %v1451_v39 }
 0x3dd   :  { %796 = vmatprep.subr.mxu1 %v1393_v23 }
 0x48d   :  { %v446_v19 = vpop.f32.mrf.mxu1 }
 0x48e   :  { %v447_v20 = vadd.f32 %v446_v19, %v177_v18  ;;  %v185_v19 = vadd.f32 %v184_v1, %v1381_v13 }
 0x48f   :  { %v448_v30 = vpop.f32.mrf.mxu1 }
 0x490   :  { %v1172_v21 = vmul.f32 -1.442695, %v447_v20  ;;  %v449_v41 = vadd.f32 %v448_v30, %v179_v40 }
 0x492   :  { %1240 = vpow2.f32 %v1172_v21  ;;  %v1173_v53 = vmul.f32 -1.442695, %v449_v41 }
 0x493   :  { %1242 = vtanh.f32 %v449_v41 }
 0x49f   :  { %v1241_v42 = vpop.eup %1240 }
 0x4a0   :  { %v454_v43 = vadd.f32 1.0, %v1241_v42  ;;  %v1243_v44 = vpop.eup %1242 }
 0x4a2   :  { %1244 = vrcp.f32 %v454_v43 }
 0x4a3   :  { %1246 = vpow2.f32 %v1173_v53 }
 0x4af   :  { %v1245_v45 = vpop.eup %1244 }
 0x4b0   :  { %v465_v46 = vmul.f32 %v1245_v45, %v1243_v44  ;;  %v1247_v54 = vpop.eup %1246  ;;  %v464_v56 = vmul.f32 %v1245_v45, %v1493_v11  ;;  %v1582_v11 = vpop.f32.mrf.mxu0 }
 0x4b1   :  { %v461_v55 = vadd.f32 1.0, %v1247_v54 }
 0x4b2   :  { %467 = vrot.lane.b32.xlu1 %v465_v46, %s1350_s1  ;;  %v1584_v12 = vpop.f32.mrf.mxu0 }
 0x4b3   :  { %1248 = vrcp.f32 %v461_v55 }
 0x4c0   :  { %v1249_v59 = vpop.eup %1248 }
 0x524   :  { %v468_v57 = vpop.permute.xlu1 %467 }
 0x525   :  { %v470_v58 = vadd.f32 %v468_v57, %v464_v56  ;;  %v191_v57 = vadd.f32 %v1568_v3, %v1381_v13 }
 0x527   :  { %1250 = vtanh.f32 %v470_v58 }
 0x534   :  { %v1251_v60 = vpop.eup %1250 }
 0x535   :  { %v472_v61 = vmul.f32 %v1251_v60, %v1249_v59 }
 0x537   :  { %476 = vrot.lane.b32.xlu0 %v472_v61, %s1350_s1 }
 0x5a9   :  { %v477_v62 = vpop.permute.xlu0 %476 }
 0x5aa   :  { %1174 = vmatmul.mubr.msk.f32.vlgmr.msra.gmra.mxu0 %vm277_vm2, %v477_v62 }
 0x5ab   :  { %697 = vmatpush1.msra.mxu0 %v1395_v24  ;;  %744 = vmatprep.mubr.f32.mxu0 %v1349_v0 }
 0x5ac   :  { %698 = vmatprep.subr.mxu0 %v1397_v25 }
 0x5ad   :  { %699 = vmatpush1.msra.mxu0 %v1400_v26 }
 0x5ae   :  { %700 = vmatprep.subr.mxu0 %v1404_v27 }
 0x5af   :  { %701 = vmatpush1.msra.mxu0 %v1408_v28 }
 0x5b0   :  { %702 = vmatprep.subr.mxu0 %v1412_v29 }
 0x5b1   :  { %703 = vmatpush1.msra.mxu0 %v1419_v31 }
 0x5b2   :  { %704 = vmatprep.subr.mxu0 %v1423_v32 }
 0x5b3   :  { %705 = vmatpush1.msra.mxu0 %v1427_v33 }
 0x5b4   :  { %706 = vmatprep.subr.mxu0 %v1431_v34 }
 0x5b5   :  { %707 = vmatpush1.msra.mxu0 %v1435_v35 }
 0x5b6   :  { %708 = vmatprep.subr.mxu0 %v1439_v36 }
 0x5b7   :  { %709 = vmatpush1.msra.mxu0 %v1443_v37 }
 0x5b8   :  { %710 = vmatprep.subr.mxu0 %v1447_v38 }
 0x5b9   :  { %711 = vmatpush1.msra.mxu0 %v1451_v39 }
 0x5ba   :  { %896 = vmatprep.subr.mxu0 %v1393_v23 }
 0x66a   :  { %v546_v15 = vpop.f32.mrf.mxu0 }
 0x66b   :  { %v547_v16 = vadd.f32 %v546_v15, %v183_v14 }
 0x66c   :  { %v548_v18 = vpop.f32.mrf.mxu0 }
 0x66d   :  { %v1175_v17 = vmul.f32 -1.442695, %v547_v16  ;;  %v549_v20 = vadd.f32 %v548_v18, %v185_v19 }
 0x66f   :  { %1252 = vpow2.f32 %v1175_v17  ;;  %v1176_v42 = vmul.f32 -1.442695, %v549_v20 }
 0x670   :  { %1254 = vtanh.f32 %v549_v20  ;;  %v195_v20 = vadd.f32 %v1570_v4, %v1378_v8 }
 0x67c   :  { %v1253_v21 = vpop.eup %1252 }
 0x67d   :  { %v554_v22 = vadd.f32 1.0, %v1253_v21  ;;  %v1255_v30 = vpop.eup %1254 }
 0x67f   :  { %1256 = vrcp.f32 %v554_v22 }
 0x680   :  { %1258 = vpow2.f32 %v1176_v42 }
 0x68c   :  { %v1257_v40 = vpop.eup %1256 }
 0x68d   :  { %v565_v41 = vmul.f32 %v1257_v40, %v1255_v30  ;;  %v1259_v43 = vpop.eup %1258  ;;  %v564_v45 = vmul.f32 %v1257_v40, %v470_v58 }
 0x68e   :  { %v561_v44 = vadd.f32 1.0, %v1259_v43 }
 0x68f   :  { %567 = vrot.lane.b32.xlu1 %v565_v41, %s1350_s1  ;;  %v197_v41 = vadd.f32 %v1572_v5, %v1381_v13 }
 0x690   :  { %1260 = vrcp.f32 %v561_v44 }
 0x69d   :  { %v1261_v48 = vpop.eup %1260 }
 0x701   :  { %v568_v46 = vpop.permute.xlu1 %567 }
 0x702   :  { %v570_v47 = vadd.f32 %v568_v46, %v564_v45 }
 0x704   :  { %1262 = vtanh.f32 %v570_v47 }
 0x711   :  { %v1263_v49 = vpop.eup %1262 }
 0x712   :  { %v572_v50 = vmul.f32 %v1263_v49, %v1261_v48 }
 0x714   :  { %576 = vrot.lane.b32.xlu0 %v572_v50, %s1350_s1 }
 0x786   :  { %v577_v51 = vpop.permute.xlu0 %576 }
 0x787   :  { %1177 = vmatmul.mubr.msk.f32.vlgmr.msra.gmra.mxu1 %vm277_vm2, %v577_v51 }
 0x788   :  { %797 = vmatpush1.msra.mxu1 %v1395_v24  ;;  %844 = vmatprep.mubr.f32.mxu1 %v1349_v0 }
 0x789   :  { %798 = vmatprep.subr.mxu1 %v1397_v25 }
 0x78a   :  { %799 = vmatpush1.msra.mxu1 %v1400_v26 }
 0x78b   :  { %800 = vmatprep.subr.mxu1 %v1404_v27 }
 0x78c   :  { %801 = vmatpush1.msra.mxu1 %v1408_v28 }
 0x78d   :  { %802 = vmatprep.subr.mxu1 %v1412_v29 }
 0x78e   :  { %803 = vmatpush1.msra.mxu1 %v1419_v31 }
 0x78f   :  { %804 = vmatprep.subr.mxu1 %v1423_v32 }
 0x790   :  { %805 = vmatpush1.msra.mxu1 %v1427_v33 }
 0x791   :  { %806 = vmatprep.subr.mxu1 %v1431_v34 }
 0x792   :  { %807 = vmatpush1.msra.mxu1 %v1435_v35 }
 0x793   :  { %808 = vmatprep.subr.mxu1 %v1439_v36 }
 0x794   :  { %809 = vmatpush1.msra.mxu1 %v1443_v37 }
 0x795   :  { %810 = vmatprep.subr.mxu1 %v1447_v38 }
 0x796   :  { %811 = vmatpush1.msra.mxu1 %v1451_v39 }
 0x797   :  { %996 = vmatprep.subr.mxu1 %v1393_v23 }
 0x847   :  { %v646_v53 = vpop.f32.mrf.mxu1 }
 0x848   :  { %v647_v54 = vadd.f32 %v646_v53, %v189_v52 }
 0x849   :  { %v648_v56 = vpop.f32.mrf.mxu1 }
 0x84a   :  { %v1178_v55 = vmul.f32 -1.442695, %v647_v54  ;;  %v649_v58 = vadd.f32 %v648_v56, %v191_v57 }
 0x84c   :  { %1264 = vpow2.f32 %v1178_v55  ;;  %v1179_v23 = vmul.f32 -1.442695, %v649_v58 }
 0x84d   :  { %1266 = vtanh.f32 %v649_v58 }
 0x859   :  { %v1265_v59 = vpop.eup %1264 }
 0x85a   :  { %v654_v60 = vadd.f32 1.0, %v1265_v59  ;;  %v1267_v61 = vpop.eup %1266 }
 0x85c   :  { %1268 = vrcp.f32 %v654_v60 }
 0x85d   :  { %1270 = vpow2.f32 %v1179_v23 }
 0x869   :  { %v1269_v62 = vpop.eup %1268 }
 0x86a   :  { %v665_v63 = vmul.f32 %v1269_v62, %v1267_v61  ;;  %v1271_v1 = vpop.eup %1270  ;;  %v664_v14 = vmul.f32 %v1269_v62, %v570_v47  ;;  %v207_v61 = vadd.f32 %v1578_v9, %v1378_v8 }
 0x86b   :  { %v661_v2 = vadd.f32 1.0, %v1271_v1 }
 0x86c   :  { %667 = vrot.lane.b32.xlu1 %v665_v63, %s1350_s1 }
 0x86d   :  { %1272 = vrcp.f32 %v661_v2  ;;  %v209_v2 = vadd.f32 %v1580_v10, %v1381_v13 }
 0x87a   :  { %v1273_v3 = vpop.eup %1272 }
 0x8de   :  { %v668_v15 = vpop.permute.xlu1 %667 }
 0x8df   :  { %v670_v16 = vadd.f32 %v668_v15, %v664_v14 }
 0x8e1   :  { %1274 = vtanh.f32 %v670_v16 }
 0x8ee   :  { %v1275_v17 = vpop.eup %1274 }
 0x8ef   :  { %v672_v18 = vmul.f32 %v1275_v17, %v1273_v3 }
 0x8f1   :  { %676 = vrot.lane.b32.xlu0 %v672_v18, %s1350_s1 }
 0x963   :  { %v677_v19 = vpop.permute.xlu0 %676 }
 0x964   :  { %1180 = vmatmul.mubr.msk.f32.vlgmr.msra.gmra.mxu0 %vm277_vm2, %v677_v19 }
 0x965   :  { %897 = vmatpush1.msra.mxu0 %v1395_v24  ;;  %944 = vmatprep.mubr.f32.mxu0 %v1349_v0 }
 0x966   :  { %898 = vmatprep.subr.mxu0 %v1397_v25 }
 0x967   :  { %899 = vmatpush1.msra.mxu0 %v1400_v26 }
 0x968   :  { %900 = vmatprep.subr.mxu0 %v1404_v27 }
 0x969   :  { %901 = vmatpush1.msra.mxu0 %v1408_v28 }
 0x96a   :  { %902 = vmatprep.subr.mxu0 %v1412_v29 }
 0x96b   :  { %903 = vmatpush1.msra.mxu0 %v1419_v31 }
 0x96c   :  { %904 = vmatprep.subr.mxu0 %v1423_v32 }
 0x96d   :  { %905 = vmatpush1.msra.mxu0 %v1427_v33 }
 0x96e   :  { %906 = vmatprep.subr.mxu0 %v1431_v34 }
 0x96f   :  { %907 = vmatpush1.msra.mxu0 %v1435_v35 }
 0x970   :  { %908 = vmatprep.subr.mxu0 %v1439_v36 }
 0x971   :  { %909 = vmatpush1.msra.mxu0 %v1443_v37 }
 0x972   :  { %910 = vmatprep.subr.mxu0 %v1447_v38 }
 0x973   :  { %911 = vmatpush1.msra.mxu0 %v1451_v39 }
 0x974   :  { %1198 = vmatprep.subr.mxu0 %v1349_v0 }
 0xa24   :  { %v746_v21 = vpop.f32.mrf.mxu0 }
 0xa25   :  { %v747_v22 = vadd.f32 %v746_v21, %v195_v20 }
 0xa26   :  { %v748_v40 = vpop.f32.mrf.mxu0 }
 0xa27   :  { %v1181_v30 = vmul.f32 -1.442695, %v747_v22  ;;  %v749_v42 = vadd.f32 %v748_v40, %v197_v41 }
 0xa29   :  { %1276 = vpow2.f32 %v1181_v30  ;;  %v1182_v48 = vmul.f32 -1.442695, %v749_v42 }
 0xa2a   :  { %1278 = vtanh.f32 %v749_v42 }
 0xa36   :  { %v1277_v43 = vpop.eup %1276 }
 0xa37   :  { %v754_v44 = vadd.f32 1.0, %v1277_v43  ;;  %v1279_v45 = vpop.eup %1278  ;;  %v213_v43 = vadd.f32 %v1582_v11, %v1378_v8  ;;  %v46_v11 = vld [vmem:[#allocation3 + $0xb0] sm:$0xff] }
 0xa39   :  { %1280 = vrcp.f32 %v754_v44 }
 0xa3a   :  { %1282 = vpow2.f32 %v1182_v48  ;;  %v215_v48 = vadd.f32 %v1584_v12, %v1381_v13 }
 0xa46   :  { %v1281_v46 = vpop.eup %1280 }
 0xa47   :  { %v765_v47 = vmul.f32 %v1281_v46, %v1279_v45  ;;  %v1283_v4 = vpop.eup %1282  ;;  %v764_v50 = vmul.f32 %v1281_v46, %v670_v16 }
 0xa48   :  { %v761_v49 = vadd.f32 1.0, %v1283_v4 }
 0xa49   :  { %767 = vrot.lane.b32.xlu1 %v765_v47, %s1350_s1 }
 0xa4a   :  { %1284 = vrcp.f32 %v761_v49 }
 0xa57   :  { %v1285_v5 = vpop.eup %1284 }
 0xabb   :  { %v768_v51 = vpop.permute.xlu1 %767 }
 0xabc   :  { %v770_v52 = vadd.f32 %v768_v51, %v764_v50 }
 0xabe   :  { %1286 = vtanh.f32 %v770_v52 }
 0xacb   :  { %v1287_v53 = vpop.eup %1286 }
 0xacc   :  { %v772_v54 = vmul.f32 %v1287_v53, %v1285_v5  ;;  %v48_v53 = vld [vmem:[#allocation3 + $0xd0] sm:$0xff] }
 0xace   :  { %776 = vrot.lane.b32.xlu0 %v772_v54, %s1350_s1 }
 0xb40   :  { %v777_v55 = vpop.permute.xlu0 %776 }
 0xb41   :  { %1183 = vmatmul.mubr.msk.f32.vlgmr.msra.gmra.mxu1 %vm277_vm2, %v777_v55 }
 0xb42   :  { %997 = vmatpush1.msra.mxu1 %v1395_v24  ;;  %1044 = vmatprep.mubr.f32.mxu1 %v1349_v0  ;;  %v201_v24 = vadd.f32 %v1574_v6, %v1378_v8  ;;  %v47_v8 = vld [vmem:[#allocation3 + $0xc0] sm:$0xff] }
 0xb43   :  { %998 = vmatprep.subr.mxu1 %v1397_v25 }
 0xb44   :  { %999 = vmatpush1.msra.mxu1 %v1400_v26 }
 0xb45   :  { %1000 = vmatprep.subr.mxu1 %v1404_v27 }
 0xb46   :  { %1001 = vmatpush1.msra.mxu1 %v1408_v28 }
 0xb47   :  { %1002 = vmatprep.subr.mxu1 %v1412_v29  ;;  %v203_v29 = vadd.f32 %v1576_v7, %v1381_v13  ;;  %v45_v13 = vld [vmem:[#allocation3 + $0xa0] sm:$0xff] }
 0xb48   :  { %1003 = vmatpush1.msra.mxu1 %v1419_v31 }
 0xb49   :  { %1004 = vmatprep.subr.mxu1 %v1423_v32 }
 0xb4a   :  { %1005 = vmatpush1.msra.mxu1 %v1427_v33 }
 0xb4b   :  { %1006 = vmatprep.subr.mxu1 %v1431_v34 }
 0xb4c   :  { %1007 = vmatpush1.msra.mxu1 %v1435_v35 }
 0xb4d   :  { %1008 = vmatprep.subr.mxu1 %v1439_v36 }
 0xb4e   :  { %1009 = vmatpush1.msra.mxu1 %v1443_v37 }
 0xb4f   :  { %1010 = vmatprep.subr.mxu1 %v1447_v38 }
 0xb50   :  { %1011 = vmatpush1.msra.mxu1 %v1451_v39 }
 0xc01   :  { %v846_v25 = vpop.f32.mrf.mxu1 }
 0xc02   :  { %v847_v26 = vadd.f32 %v846_v25, %v201_v24 }
 0xc03   :  { %v848_v28 = vpop.f32.mrf.mxu1 }
 0xc04   :  { %v1184_v27 = vmul.f32 -1.442695, %v847_v26  ;;  %v849_v31 = vadd.f32 %v848_v28, %v203_v29 }
 0xc06   :  { %1288 = vpow2.f32 %v1184_v27  ;;  %v1185_v37 = vmul.f32 -1.442695, %v849_v31 }
 0xc07   :  { %1290 = vtanh.f32 %v849_v31 }
 0xc13   :  { %v1289_v32 = vpop.eup %1288 }
 0xc14   :  { %v854_v33 = vadd.f32 1.0, %v1289_v32  ;;  %v1291_v34 = vpop.eup %1290  ;;  %v49_v32 = vld [vmem:[#allocation3 + $0xe0] ss:$0 sm:$0xff] }
 0xc16   :  { %1292 = vrcp.f32 %v854_v33 }
 0xc17   :  { %1294 = vpow2.f32 %v1185_v37 }
 0xc23   :  { %v1293_v35 = vpop.eup %1292 }
 0xc24   :  { %v865_v36 = vmul.f32 %v1293_v35, %v1291_v34  ;;  %v1295_v38 = vpop.eup %1294  ;;  %v864_v6 = vmul.f32 %v1293_v35, %v770_v52 }
 0xc25   :  { %v861_v39 = vadd.f32 1.0, %v1295_v38 }
 0xc26   :  { %867 = vrot.lane.b32.xlu1 %v865_v36, %s1350_s1 }
 0xc27   :  { %1296 = vrcp.f32 %v861_v39 }
 0xc34   :  { %v1297_v7 = vpop.eup %1296 }
 0xc98   :  { %v868_v56 = vpop.permute.xlu1 %867 }
 0xc99   :  { %v870_v57 = vadd.f32 %v868_v56, %v864_v6 }
 0xc9b   :  { %1298 = vtanh.f32 %v870_v57 }
 0xca8   :  { %v1299_v58 = vpop.eup %1298 }
 0xca9   :  { %v872_v59 = vmul.f32 %v1299_v58, %v1297_v7 }
 0xcab   :  { %876 = vrot.lane.b32.xlu0 %v872_v59, %s1350_s1 }
 0xd1d   :  { %v877_v60 = vpop.permute.xlu0 %876 }
 0xd1e   :  { %1186 = vmatmul.mubr.msk.f32.vlgmr.msra.gmra.mxu0 %vm277_vm2, %v877_v60 }
 0xd1f   :  { %1199 = vmatpush3.msra.mxu0 %v48_v53  ;;  %1206 = vmatprep.mubr.msk.f32.mxu0 %vm1351_vm3, %v1349_v0 }
 0xd20   :  { %1200 = vmatprep.subr.mxu0 %v1349_v0 }
 0xd21   :  { %1201 = vmatpush3.msra.mxu0 %v47_v8 }
 0xd22   :  { %1202 = vmatprep.subr.mxu0 %v1349_v0 }
 0xd23   :  { %1203 = vmatpush3.msra.mxu0 %v46_v11 }
 0xd24   :  { %1204 = vmatprep.subr.mxu0 %v1349_v0 }
 0xd25   :  { %1205 = vmatpush3.msra.mxu0 %v45_v13 }
 0xdde   :  { %v946_v62 = vpop.f32.mrf.mxu0 }
 0xddf   :  { %v947_v63 = vadd.f32 %v946_v62, %v207_v61 }
 0xde0   :  { %v948_v1 = vpop.f32.mrf.mxu0 }
 0xde1   :  { %v1187_v23 = vmul.f32 -1.442695, %v947_v63  ;;  %v949_v14 = vadd.f32 %v948_v1, %v209_v2 }
 0xde3   :  { %1300 = vpow2.f32 %v1187_v23  ;;  %v1188_v19 = vmul.f32 -1.442695, %v949_v14 }
 0xde4   :  { %1302 = vtanh.f32 %v949_v14 }
 0xdf0   :  { %v1301_v15 = vpop.eup %1300 }
 0xdf1   :  { %v954_v16 = vadd.f32 1.0, %v1301_v15  ;;  %v1303_v3 = vpop.eup %1302 }
 0xdf3   :  { %1304 = vrcp.f32 %v954_v16 }
 0xdf4   :  { %1306 = vpow2.f32 %v1188_v19 }
 0xe00   :  { %v1305_v17 = vpop.eup %1304 }
 0xe01   :  { %v965_v18 = vmul.f32 %v1305_v17, %v1303_v3  ;;  %v1307_v9 = vpop.eup %1306  ;;  %v964_v21 = vmul.f32 %v1305_v17, %v870_v57 }
 0xe02   :  { %v961_v20 = vadd.f32 1.0, %v1307_v9 }
 0xe03   :  { %967 = vrot.lane.b32.xlu1 %v965_v18, %s1350_s1 }
 0xe04   :  { %1308 = vrcp.f32 %v961_v20 }
 0xe11   :  { %v1309_v10 = vpop.eup %1308 }
 0xe75   :  { %v968_v22 = vpop.permute.xlu1 %967 }
 0xe76   :  { %v970_v30 = vadd.f32 %v968_v22, %v964_v21 }
 0xe78   :  { %1310 = vtanh.f32 %v970_v30 }
 0xe85   :  { %v1311_v40 = vpop.eup %1310 }
 0xe86   :  { %v972_v41 = vmul.f32 %v1311_v40, %v1309_v10 }
 0xe88   :  { %976 = vrot.lane.b32.xlu0 %v972_v41, %s1350_s1 }
 0xefa   :  { %v977_v42 = vpop.permute.xlu0 %976 }
 0xefb   :  { %1189 = vmatmul.mubr.msk.f32.vlgmr.msra.gmra.mxu1 %vm277_vm2, %v977_v42 }
 0xfbb   :  { %v1046_v44 = vpop.f32.mrf.mxu1 }
 0xfbc   :  { %v1047_v45 = vadd.f32 %v1046_v44, %v213_v43 }
 0xfbd   :  { %v1048_v47 = vpop.f32.mrf.mxu1 }
 0xfbe   :  { %v1190_v46 = vmul.f32 -1.442695, %v1047_v45  ;;  %v1049_v4 = vadd.f32 %v1048_v47, %v215_v48 }
 0xfc0   :  { %1312 = vpow2.f32 %v1190_v46  ;;  %v1191_v12 = vmul.f32 -1.442695, %v1049_v4 }
 0xfc1   :  { %1314 = vtanh.f32 %v1049_v4 }
 0xfcd   :  { %v1313_v49 = vpop.eup %1312 }
 0xfce   :  { %v1054_v50 = vadd.f32 1.0, %v1313_v49  ;;  %v1315_v51 = vpop.eup %1314 }
 0xfd0   :  { %1316 = vrcp.f32 %v1054_v50 }
 0xfd1   :  { %1318 = vpow2.f32 %v1191_v12 }
 0xfdd   :  { %v1317_v52 = vpop.eup %1316 }
 0xfde   :  { %v1065_v5 = vmul.f32 %v1317_v52, %v1315_v51  ;;  %v1319_v54 = vpop.eup %1318  ;;  %v1064_v24 = vmul.f32 %v1317_v52, %v970_v30 }
 0xfdf   :  { %v1061_v55 = vadd.f32 1.0, %v1319_v54 }
 0xfe0   :  { %1067 = vrot.lane.b32.xlu1 %v1065_v5, %s1350_s1 }
 0xfe1   :  { %1320 = vrcp.f32 %v1061_v55 }
 0xfee   :  { %v1321_v27 = vpop.eup %1320 }
0x1052   :  { %v1068_v25 = vpop.permute.xlu1 %1067 }
0x1053   :  { %v1070_v26 = vadd.f32 %v1068_v25, %v1064_v24 }
0x1055   :  { %1322 = vtanh.f32 %v1070_v26 }
0x1062   :  { %v1323_v28 = vpop.eup %1322 }
0x1063   :  { %v1072_v29 = vmul.f32 %v1323_v28, %v1321_v27 }
0x1065   :  { %1074 = vrot.lane.b32.xlu0 %v1072_v29, %s1352_s0 }
0x10d7   :  { %v1075_v31 = vpop.permute.xlu0 %1074 }
0x10d8   :  { %1207 = vmatmul.mubr.msk.f32.vlgmr.msra.gmra.mxu0 %vm1076_vm4, %v1075_v31 }
0x1198   :  { %v1145_v0 = vpop.f32.mrf.mxu0 }
0x1199   :  { %v1146_v33 = vadd.f32 %v1145_v0, %v49_v32 }
0x119a   :  { %v1208_v34 = vpop.f32.mrf.mxu0 }
0x119b   :  { %1150 = vst.msk [vmem:[%s1682_s2] sm:$0x3] %vm1149_vm5, %v1146_v33 }
0x119c   :  { %1155 = vsyncpa [#allocation4], 1 }

</bundles_post_ra>
